<compile_context>
chip_gen: v6e
topology: v6e:2x2x1
jax: 0.10.0
libtpu: 0.0.40
codegen_flags: <defaults>
</compile_context>

<pallas_src>
import jax
import jax.numpy as jnp
from jax.experimental import pallas as pl
from jax.experimental.pallas import tpu as pltpu

BN_EPS = 1e-5
VMEM_LIMIT_BYTES = 48 * 1024 * 1024


def _choose_block_rows(n):
    """Multiple of 16, <= 512, aiming for >= 4 grid steps when the batch allows."""
    if n <= 64:
        return max(16, -(-n // 16) * 16)          # single padded tile
    t = max(128, (n // 4) // 128 * 128)           # >=4 tiles of >=128 rows
    return min(t, 512)


def _layer1_stats_kernel(nrows_ref, x_ref, w1_ref, b1_ref, h_ref, stats_ref):
    """h = x @ W1 + b1 per batch tile; emit per-tile BN partial statistics."""
    i = pl.program_id(0)
    tm = h_ref.shape[0]

    # MXU: bf16 operands (cast in-kernel), f32 accumulation.
    h = jnp.dot(x_ref[...].astype(jnp.bfloat16), w1_ref[...],
                preferred_element_type=jnp.float32)
    h = h + b1_ref[...]
    # Store the intermediate in bf16 (halves HBM traffic for h).
    h_ref[...] = h.astype(jnp.bfloat16)

    # Per-tile partial stats (no carried accumulator -> 'parallel' grid axis).
    # Batch-padding rows are masked out of the statistics.
    row = i * tm + jax.lax.broadcasted_iota(jnp.int32, (tm, 1), 0)
    valid = (row < nrows_ref[0]).astype(jnp.float32)
    hv = h * valid
    partial = jnp.concatenate(
        [jnp.sum(hv, axis=0, keepdims=True),
         jnp.sum(hv * hv, axis=0, keepdims=True)],
        axis=0,
    )                                             # (2, H) f32
    stats_ref[...] = partial.reshape(stats_ref.shape)


def _bn_relu_layer2_kernel(h_ref, ss_ref, w2_ref, b2_ref, o_ref):
    """Folded BN (scale/shift) + ReLU + Linear2 per batch tile."""
    scale = ss_ref[0:1, :]
    shift = ss_ref[1:2, :]
    h = jnp.maximum(h_ref[...].astype(jnp.float32) * scale + shift, 0.0)
    out = jnp.dot(h.astype(jnp.bfloat16), w2_ref[...],
                  preferred_element_type=jnp.float32)
    out = out + b2_ref[...]
    o_ref[...] = out.astype(o_ref.dtype)


def prediction_mlp_forward(x, w1, b1, gamma, beta, w2, b2, *, block_rows=None):
    """x: (N, in_dim). Weights pre-transposed: w1 (in, hidden), w2 (hidden, out)."""
    n, in_dim = x.shape
    hidden_dim = w1.shape[1]
    out_dim = w2.shape[1]
    out_dtype = x.dtype

    tm = block_rows if block_rows is not None else _choose_block_rows(n)
    tm = max(16, (int(tm) // 16) * 16)
    num_tiles = pl.cdiv(n, tm)
    n_pad = num_tiles * tm

    x_p = x if n_pad == n else jnp.pad(x, ((0, n_pad - n), (0, 0)))
    x_p = x_p.astype(jnp.float32)             # streamed f32; bf16 cast in-kernel
    w1_bf = w1.astype(jnp.bfloat16)
    w2_bf = w2.astype(jnp.bfloat16)
    b1_2d = b1.reshape(1, hidden_dim).astype(jnp.float32)
    b2_2d = b2.reshape(1, out_dim).astype(jnp.float32)

    nrows = jnp.array([n], dtype=jnp.int32)   # scalar prefetch (true batch size)

    # ---------------- pass 1: Linear1 + per-tile BN partial stats ----------------
    cost1 = pl.CostEstimate(
        flops=2 * n_pad * in_dim * hidden_dim + 6 * n_pad * hidden_dim,
        transcendentals=0,
        bytes_accessed=(n_pad * in_dim * 4 + w1_bf.size * 2 + b1_2d.size * 4
                        + n_pad * hidden_dim * 2
                        + num_tiles * 2 * hidden_dim * 4),
    )
    h, partials = pl.pallas_call(
        _layer1_stats_kernel,
        out_shape=(jax.ShapeDtypeStruct((n_pad, hidden_dim), jnp.bfloat16),
                   jax.ShapeDtypeStruct((num_tiles, 2, hidden_dim), jnp.float32)),
        grid_spec=pltpu.PrefetchScalarGridSpec(
            num_scalar_prefetch=1,
            grid=(num_tiles,),
            in_specs=[
                pl.BlockSpec((tm, in_dim), lambda i, nr: (i, 0)),          # x: streamed f32
                pl.BlockSpec((in_dim, hidden_dim), lambda i, nr: (0, 0)),  # W1: resident
                pl.BlockSpec((1, hidden_dim), lambda i, nr: (0, 0)),       # b1: resident
            ],
            out_specs=[
                pl.BlockSpec((tm, hidden_dim), lambda i, nr: (i, 0)),        # h: streamed bf16
                pl.BlockSpec((1, 2, hidden_dim), lambda i, nr: (i, 0, 0)),   # per-tile stats
            ],
        ),
        compiler_params=pltpu.CompilerParams(
            dimension_semantics=("parallel",),
            vmem_limit_bytes=VMEM_LIMIT_BYTES),
        cost_estimate=cost1,
    )(nrows, x_p, w1_bf, b1_2d)

    # ---- tiny O(hidden_dim) XLA work: reduce partials, fold BN into scale/shift ----
    stats = jnp.sum(partials, axis=0)                                 # (2, H)
    inv_n = 1.0 / float(n)
    mean = stats[0] * inv_n
    var = jnp.maximum(stats[1] * inv_n - mean * mean, 0.0)            # biased var (BN default)
    inv_std = jax.lax.rsqrt(var + BN_EPS)
    scale = gamma.astype(jnp.float32) * inv_std
    shift = beta.astype(jnp.float32) - mean * scale
    scale_shift = jnp.stack([scale, shift], axis=0)                   # (2, H) f32

    # ---------------- pass 2: folded BN + ReLU + Linear2 ----------------
    itemsize_out = jnp.dtype(out_dtype).itemsize
    cost2 = pl.CostEstimate(
        flops=2 * n_pad * hidden_dim * out_dim + 3 * n_pad * hidden_dim,
        transcendentals=0,
        bytes_accessed=(n_pad * hidden_dim * 2 + 2 * hidden_dim * 4
                        + w2_bf.size * 2 + out_dim * 4
                        + n_pad * out_dim * itemsize_out),
    )
    out = pl.pallas_call(
        _bn_relu_layer2_kernel,
        out_shape=jax.ShapeDtypeStruct((n_pad, out_dim), out_dtype),
        grid_spec=pltpu.PrefetchScalarGridSpec(
            num_scalar_prefetch=0,
            grid=(num_tiles,),
            in_specs=[
                pl.BlockSpec((tm, hidden_dim), lambda i: (i, 0)),          # h: streamed bf16
                pl.BlockSpec((2, hidden_dim), lambda i: (0, 0)),           # scale/shift: resident
                pl.BlockSpec((hidden_dim, out_dim), lambda i: (0, 0)),     # W2: resident
                pl.BlockSpec((1, out_dim), lambda i: (0, 0)),              # b2: resident
            ],
            out_specs=pl.BlockSpec((tm, out_dim), lambda i: (i, 0)),
        ),
        compiler_params=pltpu.CompilerParams(
            dimension_semantics=("parallel",),
            vmem_limit_bytes=VMEM_LIMIT_BYTES),
        cost_estimate=cost2,
    )(h, scale_shift, w2_bf, b2_2d)

    return out[:n] if n_pad != n else out


def init_params(key, in_dim, hidden_dim, out_dim, dtype=jnp.float32):
    """Deterministic synthetic init (PyTorch-like uniform bounds)."""
    k1, k2, k3, k4 = jax.random.split(key, 4)
    bound1 = 1.0 / (in_dim ** 0.5)
    bound2 = 1.0 / (hidden_dim ** 0.5)
    w1 = jax.random.uniform(k1, (in_dim, hidden_dim), dtype, -bound1, bound1)
    b1 = jax.random.uniform(k2, (hidden_dim,), dtype, -bound1, bound1)
    gamma = jnp.ones((hidden_dim,), dtype)   # BatchNorm1d weight init
    beta = jnp.zeros((hidden_dim,), dtype)   # BatchNorm1d bias init
    w2 = jax.random.uniform(k3, (hidden_dim, out_dim), dtype, -bound2, bound2)
    b2 = jax.random.uniform(k4, (out_dim,), dtype, -bound2, bound2)
    return w1, b1, gamma, beta, w2, b2


def reference_forward_f32(x, w1, b1, gamma, beta, w2, b2):
    """Pure-f32 PyTorch-semantics reference (training-mode BN, batch stats)."""
    h = jnp.dot(x, w1) + b1
    mean = jnp.mean(h, axis=0, keepdims=True)
    var = jnp.mean((h - mean) ** 2, axis=0, keepdims=True)
    h = (h - mean) * jax.lax.rsqrt(var + BN_EPS) * gamma + beta
    h = jnp.maximum(h, 0.0)
    return jnp.dot(h, w2) + b2


def reference_forward_matched(x, w1, b1, gamma, beta, w2, b2):
    """Reference mirroring the kernel's precision: bf16 MXU inputs, f32 acc,
    E[h^2]-mean^2 stats on the f32 h, bf16-stored h intermediate."""
    h = jnp.dot(x.astype(jnp.bfloat16), w1.astype(jnp.bfloat16),
                preferred_element_type=jnp.float32) + b1
    mean = jnp.mean(h, axis=0)
    var = jnp.maximum(jnp.mean(h * h, axis=0) - mean * mean, 0.0)
    scale = gamma * jax.lax.rsqrt(var + BN_EPS)
    shift = beta - mean * scale
    hb = h.astype(jnp.bfloat16).astype(jnp.float32)
    hr = jnp.maximum(hb * scale + shift, 0.0)
    return jnp.dot(hr.astype(jnp.bfloat16), w2.astype(jnp.bfloat16),
                   preferred_element_type=jnp.float32) + b2


# TODO(synk): BatchNorm1d running_mean/running_var buffer updates (training-mode
# side effect) are not materialized; only the forward output is produced.

if __name__ == "__main__":
    # Small shapes consistent with the module's (in_dim, hidden_dim, out_dim)
    # bottleneck structure.  batch=40 with block_rows=16 exercises multi-tile
    # per-tile stats AND the padded-row masking path (40 -> 48 padded rows).
    batch, in_dim, hidden_dim, out_dim = 40, 128, 64, 128

    key = jax.random.PRNGKey(0)
    kx, kp = jax.random.split(key)
    x = jax.random.normal(kx, (batch, in_dim), jnp.float32)
    params = init_params(kp, in_dim, hidden_dim, out_dim)

    out = prediction_mlp_forward(x, *params, block_rows=16)
    out = jax.block_until_ready(out)
    assert out.shape == (batch, out_dim)

    # Tight check vs a reference that mirrors the kernel's bf16/f32 precision.
    ref_m = reference_forward_matched(x, *params)
    assert jnp.allclose(out, ref_m, atol=3e-3, rtol=3e-3), \
        "mismatch vs precision-matched reference"

    # Loose check vs pure-f32 PyTorch semantics (bf16 MXU inputs / bf16 h only
    # introduce small rounding differences).
    ref_f32 = reference_forward_f32(x, *params)
    assert jnp.allclose(out, ref_f32, atol=7e-2, rtol=7e-2), \
        "mismatch vs f32 reference"

    print("KERNEL_OK")
</pallas_src>

<mosaic_0001>
module attributes {stable_mosaic.version = 11 : i64} {
  func.func @_layer1_stats_kernel(%arg0: i32, %arg1: memref<1xi32, #tpu.memory_space<smem>>, %arg2: memref<16x128xf32, #tpu.memory_space<vmem>>, %arg3: memref<128x64xbf16, #tpu.memory_space<vmem>>, %arg4: memref<1x64xf32, #tpu.memory_space<vmem>>, %arg5: memref<16x64xbf16, #tpu.memory_space<vmem>>, %arg6: memref<1x2x64xf32, #tpu.memory_space<vmem>>) attributes {dimension_semantics = [#tpu.dimension_semantics<parallel>], iteration_bounds = array<i64: 3>, scalar_prefetch = 1 : i64, scratch_operands = 0 : i64, tpu.core_type = #tpu.core_type<tc>, window_params = [{transform_indices = @transform_0, window_bounds = array<i64: 16, 128>}, {pipeline_mode = #tpu.pipeline_mode<synchronous>, transform_indices = @transform_1, window_bounds = array<i64: 128, 64>}, {pipeline_mode = #tpu.pipeline_mode<synchronous>, transform_indices = @transform_2, window_bounds = array<i64: 1, 64>}, {transform_indices = @transform_3, window_bounds = array<i64: 16, 64>}, {transform_indices = @transform_4, window_bounds = array<i64: 1, 2, 64>}]} {
    %c0 = arith.constant 0 : index
    %c0_0 = arith.constant 0 : index
    %0 = vector.load %arg2[%c0, %c0_0] : memref<16x128xf32, #tpu.memory_space<vmem>>, vector<16x128xf32>
    %1 = arith.truncf %0 : vector<16x128xf32> to vector<16x128xbf16>
    %c0_1 = arith.constant 0 : index
    %c0_2 = arith.constant 0 : index
    %2 = vector.load %arg3[%c0_1, %c0_2] : memref<128x64xbf16, #tpu.memory_space<vmem>>, vector<128x64xbf16>
    %cst = arith.constant dense<0.000000e+00> : vector<16x64xf32>
    %3 = tpu.matmul %1, %2, %cst {dimension_numbers = #tpu.dot_dimension_numbers<[1], [0], [0], [1], [0, 0, 1, 1], [], []>} : vector<16x128xbf16>, vector<128x64xbf16>, vector<16x64xf32> -> vector<16x64xf32>
    %c0_3 = arith.constant 0 : index
    %c0_4 = arith.constant 0 : index
    %4 = vector.load %arg4[%c0_3, %c0_4] : memref<1x64xf32, #tpu.memory_space<vmem>>, vector<1x64xf32>
    %5 = vector.broadcast %4 : vector<1x64xf32> to vector<16x64xf32>
    %6 = arith.addf %3, %5 : vector<16x64xf32>
    %7 = arith.truncf %6 : vector<16x64xf32> to vector<16x64xbf16>
    %c0_5 = arith.constant 0 : index
    %c0_6 = arith.constant 0 : index
    %8 = vector.load %arg5[%c0_5, %c0_6] : memref<16x64xbf16, #tpu.memory_space<vmem>>, vector<16x64xbf16>
    tpu.vector_store %arg5[%c0_5, %c0_6], %7 {strides = array<i32>} : memref<16x64xbf16, #tpu.memory_space<vmem>>, vector<16x64xbf16>,
    %c16_i32 = arith.constant 16 : i32
    %9 = arith.muli %arg0, %c16_i32 : i32
    %10 = tpu.iota {dimensions = array<i32: 0>} : vector<16x1xi32>
    %11 = vector.broadcast %9 : i32 to vector<16x1xi32>
    %12 = arith.addi %11, %10 : vector<16x1xi32>
    %c0_7 = arith.constant 0 : index
    %13 = memref.load %arg1[%c0_7] : memref<1xi32, #tpu.memory_space<smem>>
    %14 = vector.broadcast %13 : i32 to vector<16x1xi32>
    %15 = arith.cmpi slt, %12, %14 : vector<16x1xi32>
    %16 = arith.extui %15 : vector<16x1xi1> to vector<16x1xi32>
    %17 = arith.sitofp %16 : vector<16x1xi32> to vector<16x1xf32>
    %18 = vector.broadcast %17 : vector<16x1xf32> to vector<16x64xf32>
    %19 = arith.mulf %6, %18 : vector<16x64xf32>
    %cst_8 = arith.constant dense<0.000000e+00> : vector<64xf32>
    %20 = vector.multi_reduction <add>, %19, %cst_8 [0] : vector<16x64xf32> to vector<64xf32>
    %21 = vector.shape_cast %20 : vector<64xf32> to vector<1x64xf32>
    %22 = arith.mulf %19, %19 : vector<16x64xf32>
    %cst_9 = arith.constant dense<0.000000e+00> : vector<64xf32>
    %23 = vector.multi_reduction <add>, %22, %cst_9 [0] : vector<16x64xf32> to vector<64xf32>
    %24 = vector.shape_cast %23 : vector<64xf32> to vector<1x64xf32>
    %25 = tpu.concatenate %21, %24 in 0 : vector<1x64xf32>, vector<1x64xf32> -> vector<2x64xf32>
    %26 = vector.shape_cast %25 : vector<2x64xf32> to vector<1x2x64xf32>
    %c0_10 = arith.constant 0 : index
    %c0_11 = arith.constant 0 : index
    %c0_12 = arith.constant 0 : index
    %27 = vector.load %arg6[%c0_10, %c0_11, %c0_12] : memref<1x2x64xf32, #tpu.memory_space<vmem>>, vector<1x2x64xf32>
    tpu.vector_store %arg6[%c0_10, %c0_11, %c0_12], %26 {strides = array<i32>} : memref<1x2x64xf32, #tpu.memory_space<vmem>>, vector<1x2x64xf32>,
    return
  }
  func.func @transform_0(%arg0: i32, %arg1: memref<1xi32, #tpu.memory_space<smem>>) -> (i32, i32) {
    %c0_i32 = arith.constant 0 : i32
    %c0_i32_0 = arith.constant 0 : i32
    return %arg0, %c0_i32 : i32, i32
  }
  func.func @transform_1(%arg0: i32, %arg1: memref<1xi32, #tpu.memory_space<smem>>) -> (i32, i32) {
    %c0_i32 = arith.constant 0 : i32
    %c0_i32_0 = arith.constant 0 : i32
    %c0_i32_1 = arith.constant 0 : i32
    return %c0_i32, %c0_i32_0 : i32, i32
  }
  func.func @transform_2(%arg0: i32, %arg1: memref<1xi32, #tpu.memory_space<smem>>) -> (i32, i32) {
    %c0_i32 = arith.constant 0 : i32
    %c0_i32_0 = arith.constant 0 : i32
    %c0_i32_1 = arith.constant 0 : i32
    return %c0_i32, %c0_i32_0 : i32, i32
  }
  func.func @transform_3(%arg0: i32, %arg1: memref<1xi32, #tpu.memory_space<smem>>) -> (i32, i32) {
    %c0_i32 = arith.constant 0 : i32
    %c0_i32_0 = arith.constant 0 : i32
    return %arg0, %c0_i32 : i32, i32
  }
  func.func @transform_4(%arg0: i32, %arg1: memref<1xi32, #tpu.memory_space<smem>>) -> (i32, i32, i32) {
    %c0_i32 = arith.constant 0 : i32
    %c0_i32_0 = arith.constant 0 : i32
    %c0_i32_1 = arith.constant 0 : i32
    return %arg0, %c0_i32, %c0_i32_0 : i32, i32, i32
  }
}

</mosaic_0001>

<bundles_post_ra>
// kernel: tpu_custom_call.1
= control target key start
LH: loop header
LB: loop body
LE: loop exit
PB: predicated region body
PF: predicated region fallthrough
CT: control target
= control target key end

     0   :  { %s917_s0 = inlined_call_operand.<no memory space> [shape: s32[1], index: 0, kind: input, shape index: {}]   ;;  %s918_s1 = inlined_call_operand.vmem [shape: f32[48,128], index: 1, kind: input, shape index: {}]   ;;  %s919_s2 = inlined_call_operand.vmem [shape: bf16[128,64], index: 2, kind: input, shape index: {}]   ;;  %s920_s3 = inlined_call_operand.vmem [shape: f32[1,64], index: 3, kind: input, shape index: {}]   ;;  %s921_s4 = inlined_call_operand.hbm [shape: bf16[48,64], index: 4, kind: output, shape index: {0}]   ;;  %s922_s5 = inlined_call_operand.hbm [shape: f32[3,2,64], index: 5, kind: output, shape index: {1}]  }
   0x1   :  { %11 = sst [smem:[#allocation3]] %s917_s0 }
   0x2   :  { %12 = vsyncpa [#allocation5], 0 }
   0x3   :  { %14 = vsyncpa [#allocation5 + $0x1], 0 }
   0x4   :  { %15 = vsyncpa [#allocation7], 0 }
   0x5   :  { %17 = vsyncpa [#allocation7 + $0x1], 0  ;;  %s755_s20 = smov 0   ;;  %s757_s21 = smov 0  }
   0x6   :  { %s759_s22 = smov 0   ;;  %s761_s23 = smov 0  }
   0x7 LB: > { %s776_s0 = sadd.s32 4294967295, %s714_s23   ;;  %s507_s24 = sadd.s32 4294967294, %s714_s23   ;;  %s714_s23 = sphi %s761_s23, %s928_s23   ;;  %s710_s22 = sphi %s759_s22, %s927_s22   ;;  %s706_s21 = sphi %s757_s21, %s926_s21   ;;  %s702_s20 = sphi %s755_s20, %s925_s20  }
   0x8   : > { %s780_s25 = sadd.s32 1, %s714_s23   ;;  %s98_s26 = sadd.s32 1, %s710_s22 }
   0x9   : > { %s95_s27 = ssub.s32 %s714_s23, %s780_s25  ;;  %p108_p0 = scmp.ne.s32.totalorder %s710_s22, %s706_s21 }
   0xa   : > { %p96_p1 = scmp.eq.s32.totalorder %s95_s27, 0  ;;  %p109_p2 = scmp.eq.s32.totalorder %s776_s0, 2 }
   0xb   : > { %p114_p3 = scmp.ne.s32.totalorder %s706_s21, %s702_s20  ;;  %p115_p4 = scmp.eq.s32.totalorder %s507_s24, 2 }
   0xc   : > { %s791_s28 = scalar_select %p96_p1, %s710_s22, %s98_s26  }
   0xd   : > { %p793_p5 = por %p109_p2, %p108_p0  ;;  %p797_p6 = por %p115_p4, %p114_p3 }
   0xe   : > { %p510_p7 = scmp.ge.s32.totalorder %s714_s23, 1  ;;  %p174_p8 = scmp.lt.s32.totalorder %s714_s23, 4 }
  0x10   : > { %p175_p9 = pnand %p510_p7, %p174_p8 }
  0x11   : > { %s513_s12 = sshll.u32 (!%p175_p9), %s776_s0, 1  ;;  %s346_s10 = sld [smem:[#allocation3]] (!%p175_p9) }
  0x12   : > { %178 = sbr.rel (%p175_p9) target bundleno = 299 (0x12b), region = 32  ;;  %p206_p10 = scmp.lt.s32.totalorder (!%p175_p9), %s513_s12, 5 }
  0x13   : > { %s526_s11 = sshll.u32 (!%p175_p9), %s776_s0, 4  ;;  %s538_s18 = sshll.u32 (!%p175_p9), %s776_s0, 7 }
  0x14   : > { %s844_s26 = scalar_lea.hbm (!%p175_p9), %s921_s4, %s538_s18 }
  0x17   : > { %v616_v0 = vld [vmem:[%s919_s2 + $0x38] sm:$0xff]   ;;  %v716_v1 = vmov 0.0   ;;  %v617_v2 = vld [vmem:[%s919_s2 + $0x30] sm:$0xff]   ;;  %vm717_vm0 = vmmov 0   ;;  %v618_v3 = vld [vmem:[%s919_s2 + $0x28] sm:$0xff]   ;;  %s930_s12 = smov (!%p206_p10, %s513_s12), 5  ;;  %v340_v12 = vlaneseq  ;;  %v343_v14 = vstv %s526_s11 }
  0x18   : > { %548 = vmatprep.subr.bf16.mxu0 %v716_v1  ;;  %564 = vmatprep.mubr.msk.bf16.mxu0 %vm717_vm0, %v716_v1  ;;  %v619_v4 = vld [vmem:[%s919_s2 + $0x20] sm:$0xff]   ;;  %v620_v5 = vld [vmem:[%s919_s2 + $0x18] sm:$0xff]   ;;  %v621_v6 = vld [vmem:[%s919_s2 + $0x10] sm:$0xff]   ;;  %s514_s19 = sshll.u32 %s930_s12, 3  ;;  %v347_v17 = vstv %s346_s10  ;;  %s833_s12 = sand.u32 1, %s706_s21   ;;  %vm336_vm3 = vcmask 519168  }
  0x19   : > { %549 = vmatpush3.bf16.msra.mxu0 %v616_v0  ;;  %v622_v7 = vld [vmem:[%s919_s2 + $0x8] sm:$0xff]   ;;  %s209_s7 = scalar_lea.vmem %s918_s1, %s514_s19  ;;  %v623_v8 = vld [vmem:[%s919_s2] sm:$0xff]   ;;  %v341_v13 = vshrl.u32 %v340_v12, 7  ;;  %s511_s15 = sshll.u32 %s833_s12, 3  ;;  %vm356_vm4 = vcmask 523264  }
  0x1a   : > { %550 = vmatprep.subr.bf16.mxu0 %v716_v1  ;;  %v213_v9 = vld [vmem:[%s209_s7] sm:$0xff]  ;;  %v214_v10 = vld [vmem:[%s209_s7 + $0x8] sm:$0xff]  ;;  %s197_s16 = scalar_lea.vmem [#allocation4], %s511_s15  ;;  %s382_s27 = scalar_lea.sflag [#allocation5], %s833_s12 }
  0x1b   : > { %v215_v11 = vpack.c.bf16 %v214_v10, %v213_v9  ;;  %v344_v15 = vadd.s32 %v343_v14, %v341_v13  ;;  %v342_v16 = vadd.s32 8, %v341_v13  ;;  %v515_v19 = vld [vmem:[%s920_s3] ss:$0 sm:$0xff]  ;;  %s400_s17 = sshll.u32 %s197_s16, 4  ;;  %s718_s7 = smov [#allocation4]   ;;  %s846_s17 = int_to_ptr.vmem [resolvable:$true] %s400_s17 }
  0x1c   : > { %s624_s6 = scalar_lea.vmem %s846_s17, 128  ;;  %s628_s8 = sshll.u32 %s718_s7, 4  ;;  %s629_s8 = int_to_ptr.vmem [resolvable:$false] %s628_s8 }
  0x1d   : > { %551 = vmatpush3.bf16.msra.mxu0 %v617_v2  ;;  %vm348_vm1 = vcmp.lt.s32.totalorder %v344_v15, %v347_v17  ;;  %v345_v18 = vadd.s32 %v343_v14, %v342_v16  ;;  %p625_p11 = scmp.ne.s32.totalorder %s846_s17, %s624_s6  ;;  %s630_s9 = scalar_lea.vmem %s629_s8, 256 }
  0x1e   : > { %552 = vmatprep.subr.bf16.mxu0 %v716_v1  ;;  %v527_v21 = vsel %vm348_vm1, 1.0, %v716_v1  ;;  %p631_p0 = scmp.lt.s32.totalorder %s846_s17, %s629_s8  ;;  %p632_p1 = scmp.lt.s32.totalorder %s630_s9, %s624_s6 }
  0x1f   : > { %vm349_vm2 = vcmp.lt.s32.totalorder %v345_v18, %v347_v17  ;;  %p626_p12 = pnand %p625_p11, %p793_p5 }
  0x20   : > { %v528_v27 = vsel %vm349_vm2, 1.0, %v716_v1  ;;  %p633_p2 = por %p632_p1, %p631_p0 }
  0x21   : > { %553 = vmatpush3.bf16.msra.mxu0 %v618_v3  ;;  %p627_p13 = pneg %p626_p12 }
  0x22   : > { %554 = vmatprep.subr.bf16.mxu0 %v716_v1 }
  0x23   : > { %p634_p3 = pnand %p633_p2, %p627_p13 }
  0x25   : > { %555 = vmatpush3.bf16.msra.mxu0 %v619_v4 }
  0x26   : > { %556 = vmatprep.subr.bf16.mxu0 %v716_v1 }
  0x29   : > { %557 = vmatpush3.bf16.msra.mxu0 %v620_v5 }
  0x2a   : > { %558 = vmatprep.subr.bf16.mxu0 %v716_v1 }
  0x2d   : > { %559 = vmatpush3.bf16.msra.mxu0 %v621_v6 }
  0x2e   : > { %560 = vmatprep.subr.bf16.mxu0 %v716_v1 }
  0x31   : > { %561 = vmatpush3.bf16.msra.mxu0 %v622_v7 }
  0x32   : > { %562 = vmatprep.subr.bf16.mxu0 %v716_v1 }
  0x35   : > { %563 = vmatpush3.bf16.msra.mxu0 %v623_v8 }
  0x38   : > { %565 = vmatmul.mubr.bf16.vlgmr.msra.gmra.mxu0 %v215_v11 }
  0xf8   : > { %v321_v20 = vpop.f32.mrf.mxu0 }
  0xf9   : > { %v322_v22 = vadd.f32 %v515_v19, %v321_v20 }
  0xfa   : > { %v566_v23 = vpop.f32.mrf.mxu0 }
  0xfb   : > { %v536_v24 = vpack.c.bf16 %v322_v22, %v322_v22  ;;  %v354_v25 = vmul.f32 %v527_v21, %v322_v22 }
  0xfc   : > { %v324_v26 = vpop.f32.mrf.mxu0 }
  0xfd   : > { %337 = vst.msk [vmem:[%s197_s16] sm:$0xf] %vm336_vm3, %v536_v24  ;;  %v325_v28 = vadd.f32 %v515_v19, %v324_v26  ;;  %v366_v30 = vmul.f32 %v354_v25, %v354_v25  ;;  %v357_v33 = vsel %vm356_vm4, %v354_v25, 0.0 }
  0xfe   : > { %v567_v29 = vpop.f32.mrf.mxu0 }
  0xff   : > { %v537_v31 = vpack.c.bf16 %v325_v28, %v325_v28  ;;  %v355_v32 = vmul.f32 %v528_v27, %v325_v28 }
 0x101   : > { %338 = vst.msk [vmem:[%s197_s16 + $0x4] sm:$0xf] %vm336_vm3, %v537_v31  ;;  %v358_v34 = vsel %vm356_vm4, %v355_v32, 0.0  ;;  %v367_v35 = vmul.f32 %v355_v32, %v355_v32 }
 0x102   : > { %v359_v36 = vadd.f32 %v358_v34, %v357_v33 }
 0x103   : > { %637 = shalt.err (!%p634_p3)
}
 0x104   : > { %s638_s10 = scalar_lea.hbm %s844_s26, 128  ;;  %s642_s14 = scalar_lea.hbm %s921_s4, 384 }
 0x105   : > { %p639_p4 = scmp.ne.s32.totalorder %s844_s26, %s638_s10  ;;  %p643_p9 = scmp.lt.s32.totalorder %s844_s26, %s921_s4 }
 0x106   : > { %p644_p10 = scmp.lt.s32.totalorder %s642_s14, %s638_s10 }
 0x107   : > { %p640_p7 = pnand %p639_p4, %p793_p5 }
 0x108   : > { %p645_p11 = por %p644_p10, %p643_p9 }
 0x109   : > { %p641_p8 = pneg %p640_p7 }
 0x10b   : > { %p646_p12 = pnand %p645_p11, %p641_p8 }
 0x10d   : > { %649 = shalt.err (!%p646_p12)
}
 0x10e   : > { %s719_s18 = smov 64   ;;  %s720_s19 = smov 4   ;;  %v368_v37 = vsel %vm356_vm4, %v366_v30, 0.0  ;;  %v369_v38 = vsel %vm356_vm4, %v367_v35, 0.0  ;;  %v360_v39 = vrot.slane %v359_v36, 4  ;;  %vm377_vm5 = vcmask 1040384  }
 0x10f   : > { %568 = dma.vmem_to_hbm [thread:$0]  (%p793_p5), %s846_s17, 128, %s844_s26, %s382_s27, %s719_s18, %s719_s18, %s720_s19   ;;  %v370_v40 = vadd.f32 %v369_v38, %v368_v37  ;;  %vm379_vm6 = vcmask 517120  }
 0x110   : > { %v361_v41 = vadd.f32 %v360_v39, %v359_v36  ;;  %s512_s24 = sshll.u32 %s833_s12, 1  ;;  %s533_s6 = sshll.u32 %s776_s0, 5 }
 0x111   : > { %v371_v42 = vrot.slane %v370_v40, 4  ;;  %s204_s17 = scalar_lea.vmem [#allocation6], %s512_s24  ;;  %s881_s8 = scalar_lea.hbm %s922_s5, %s533_s6 }
 0x112   : > { %v362_v43 = vrot.slane %v361_v41, 2  ;;  %s416_s26 = sshll.u32 %s204_s17, 4  ;;  %s387_s9 = scalar_lea.sflag [#allocation7], %s833_s12  ;;  %s417_s26 = int_to_ptr.vmem [resolvable:$true] %s416_s26 }
 0x113   : > { %v372_v44 = vadd.f32 %v371_v42, %v370_v40  ;;  %s650_s10 = scalar_lea.vmem %s417_s26, 32  ;;  %s721_s0 = smov [#allocation6]  }
 0x114   : > { %v363_v45 = vadd.f32 %v362_v43, %v361_v41  ;;  %p651_p13 = scmp.ne.s32.totalorder %s417_s26, %s650_s10  ;;  %s654_s11 = sshll.u32 %s721_s0, 4  ;;  %s655_s11 = int_to_ptr.vmem [resolvable:$false] %s654_s11 }
 0x115   : > { %v373_v46 = vrot.slane %v372_v44, 2  ;;  %s656_s13 = scalar_lea.vmem %s655_s11, 64  ;;  %p657_p2 = scmp.lt.s32.totalorder %s417_s26, %s655_s11 }
 0x116   : > { %v364_v47 = vrot.slane %v363_v45, 1  ;;  %p652_p0 = pnand %p651_p13, %p793_p5  ;;  %p658_p3 = scmp.lt.s32.totalorder %s656_s13, %s650_s10 }
 0x117   : > { %v374_v48 = vadd.f32 %v373_v46, %v372_v44 }
 0x118   : > { %v365_v50 = vadd.f32 %v364_v47, %v363_v45  ;;  %p653_p1 = pneg %p652_p0  ;;  %p659_p4 = por %p658_p3, %p657_p2 }
 0x119   : > { %v375_v49 = vrot.slane %v374_v48, 1 }
 0x11a   : > { %p660_p7 = pnand %p659_p4, %p653_p1 }
 0x11b   : > { %v376_v51 = vadd.f32 %v375_v49, %v374_v48 }
 0x11d   : > { %v378_v52 = vsel %vm377_vm5, %v365_v50, %v376_v51 }
 0x11e   : > { %380 = vst.msk [vmem:[%s204_s17] sm:$0x3] %vm379_vm6, %v378_v52 }
 0x11f   : > { %663 = shalt.err (!%p660_p7)
}
 0x120   : > { %s664_s14 = scalar_lea.hbm %s881_s8, 32  ;;  %s668_s16 = scalar_lea.hbm %s922_s5, 96 }
 0x121   : > { %p665_p8 = scmp.ne.s32.totalorder %s881_s8, %s664_s14  ;;  %p669_p11 = scmp.lt.s32.totalorder %s881_s8, %s922_s5 }
 0x122   : > { %p670_p12 = scmp.lt.s32.totalorder %s668_s16, %s664_s14 }
 0x123   : > { %p666_p9 = pnand %p665_p8, %p793_p5 }
 0x124   : > { %p671_p13 = por %p670_p12, %p669_p11 }
 0x125   : > { %p667_p10 = pneg %p666_p9 }
 0x127   : > { %p672_p0 = pnand %p671_p13, %p667_p10 }
 0x129   : > { %675 = shalt.err (!%p672_p0)
}
 0x12a   : > { %569 = dma.vmem_to_hbm [thread:$0]  (%p793_p5), %s417_s26, 32, %s881_s8, %s387_s9  }
 0x12b PF: > { %p579_p1 = scmp.ge.s32.totalorder %s714_s23, 2  ;;  %s428_s24 = sand.u32 1, %s702_s20  }
 0x12c   : > { %s429_s6 = scalar_lea.sflag [#allocation5], %s428_s24 }
 0x12d   : > { %p573_p2 = pnand %p579_p1, %p797_p6 }
 0x12f   : > { %p574_p3 = pneg %p573_p2 }
 0x131   : > { %693 = dma.done.wait (%p574_p3), %s429_s6, 128  }
 0x132   : > { %695 = vsyncadd (%p574_p3), %s429_s6, 4294967168  ;;  %s438_s17 = scalar_lea.sflag [#allocation7], %s428_s24 }
 0x133   : > { %697 = dma.done.wait (%p574_p3), %s438_s17, 32  }
 0x134   : > { %699 = vsyncadd (%p574_p3), %s438_s17, 4294967264  ;;  %p20_p5 = scmp.ge.s32.totalorder %s780_s25, 5   ;;  %s925_s20 = smov %s706_s21 }
 0x135   : > { %s926_s21 = smov %s710_s22  ;;  %s927_s22 = smov %s791_s28 }
 0x136   : > { %s928_s23 = smov %s780_s25  ;;  %22 = sbr.rel (!%p20_p5) target bundleno = 7 (0x7), region = 84 }
 0x13b   :  { %443 = vsyncpa [#allocation5], 1 }
 0x13c   :  { %445 = vsyncpa [#allocation5 + $0x1], 1 }
 0x13d   :  { %446 = vsyncpa [#allocation7], 1 }
 0x13e   :  { %448 = vsyncpa [#allocation7 + $0x1], 1 }

</bundles_post_ra>
